<compile_context>
chip_gen: v5e
topology: v5e:2x2
jax: 0.10.0
libtpu: 0.0.40
codegen_flags: <defaults>
</compile_context>

<pallas_src>
import functools

import jax
import jax.numpy as jnp
from jax.experimental import pallas as pl
from jax.experimental.pallas import tpu as pltpu


def _transition_kernel(x_ref, scale_ref, shift_ref, w_ref, p_ref, o_ref,
                       pooled_ref, *, n_sub, pool):
    # x_ref:      (1, Cin, TILE_L)      native dtype (bf16/f32) NCL tile
    # scale_ref:  (Cin, 1)              f32   folded BN scale = gamma/sqrt(var+eps)
    # shift_ref:  (Cin, 1)              f32   folded BN shift = beta - mean*scale
    # w_ref:      (Cout, Cin)           bf16  1x1 conv weight, pre-divided by pool
    # p_ref:      (128*pool, 128)       bf16  0/1 pooling-window indicator
    # o_ref:      (1, Cout, TILE_Lp)    output dtype, NCL tile
    # pooled_ref: (Cin, TILE_Lp)        bf16  VMEM scratch (pooled activations)
    sub = 128 * pool
    for j in range(n_sub):  # static unrolled loop over 128-lane output sub-blocks
        xs = x_ref[0, :, pl.ds(j * sub, sub)].astype(jnp.float32)   # (Cin, 128*pool)
        # BN + ReLU in f32 on the VPU (safe on v5e; VPU is not the bottleneck).
        h = jnp.maximum(xs * scale_ref[...] + shift_ref[...], 0.0)
        # Pool this sub-block on the MXU against the small 0/1 indicator; the
        # 1/pool normalization is folded into w_ref.  Cast-to-bf16 is fused
        # into the scratch store (no full-width astype pass later).
        pooled_ref[:, pl.ds(j * 128, 128)] = jnp.dot(
            h.astype(jnp.bfloat16), p_ref[...],
            preferred_element_type=jnp.float32).astype(jnp.bfloat16)
    # One wide 1x1-conv matmul on the pooled activations (bf16 MXU, f32 acc).
    y = jnp.dot(w_ref[...], pooled_ref[...],
                preferred_element_type=jnp.float32)                 # (Cout, TILE_Lp)
    o_ref[0] = y.astype(o_ref.dtype)


def _block_pair_byte_cap():
    """Per-buffer byte budget for one (input block + output block) pair,
    chosen per TPU generation (conservative fallback if the query fails)."""
    try:
        vmem = pltpu.get_tpu_info().vmem_capacity_bytes
    except Exception:
        vmem = 64 << 20
    # 128-MiB-VMEM parts (v5e/v6e): ~8 MiB per pair; 64-MiB parts (v7x): ~5 MiB.
    return (8 << 20) if vmem >= (100 << 20) else (5 << 20)


def _choose_tile_l(l_pad, cin, cout, pool, in_bytes, out_bytes, n_batch):
    """Lane-aligned L tile: multiple of 128*pool dividing l_pad, grown until the
    (input + output) block pair hits the generation-aware byte cap, then shrunk
    if needed so the parallel grid keeps >= 2 steps (v7x has 2 TensorCores)."""
    base = 128 * pool

    def pair_bytes(tile_l):
        return cin * tile_l * in_bytes + cout * (tile_l // pool) * out_bytes

    cap = _block_pair_byte_cap()
    tile = base
    while (tile * 2 <= l_pad and l_pad % (tile * 2) == 0
           and pair_bytes(tile * 2) <= cap):
        tile *= 2
    # Keep at least 2 grid steps across the parallel axes when possible.
    while n_batch * (l_pad // tile) < 2 and tile > base and l_pad % (tile // 2) == 0:
        tile //= 2
    return tile


def transition_block_pallas(x_ncl, gamma, beta, run_mean, run_var, conv_w, *,
                            pool=2, eps=1e-5, out_dtype=None):
    """x_ncl: (N, Cin, L); conv_w: (Cout, Cin, 1) like nn.Conv1d weight.
    Returns (N, Cout, L // pool) in x's dtype (or out_dtype), matching the
    PyTorch module in inference mode."""
    N, Cin, L = x_ncl.shape
    Cout = conv_w.shape[0]
    Lp = L // pool
    out_dtype = x_ncl.dtype if out_dtype is None else out_dtype

    # Fold BatchNorm (inference) into per-channel scale/shift, shaped (Cin, 1)
    # so they broadcast over the lane (length) dim of the NCL layout.
    scale_1d = (gamma.astype(jnp.float32) /
                jnp.sqrt(run_var.astype(jnp.float32) + eps))
    shift_1d = beta.astype(jnp.float32) - run_mean.astype(jnp.float32) * scale_1d
    scale = scale_1d.reshape(Cin, 1)
    shift = shift_1d.reshape(Cin, 1)

    # 1x1 conv weight (Cout, Cin); fold 1/pool so the indicator is pure 0/1.
    w = (conv_w[:, :, 0].astype(jnp.float32) / float(pool)).astype(jnp.bfloat16)

    # Pad L to a multiple of 128*pool: lane-dense input AND output tiles,
    # bounded VMEM.  Kept windows (j < Lp) never touch the zero padding, so
    # AvgPool1d floor semantics are preserved; padded windows are sliced off.
    base = 128 * pool
    L_pad = ((L + base - 1) // base) * base
    if L_pad != L:
        x_ncl = jnp.pad(x_ncl, ((0, 0), (0, 0), (0, L_pad - L)))
    Lp_pad = L_pad // pool

    in_bytes = x_ncl.dtype.itemsize
    out_bytes = jnp.dtype(out_dtype).itemsize
    tile_l = _choose_tile_l(L_pad, Cin, Cout, pool, in_bytes, out_bytes, N)
    tile_lp = tile_l // pool
    n_lt = L_pad // tile_l
    n_sub = tile_l // base

    # Small, fixed pooling indicator P: (128*pool, 128), P[i, j] = 1 iff i//pool == j.
    rows = jax.lax.broadcasted_iota(jnp.int32, (base, 128), 0)
    cols = jax.lax.broadcasted_iota(jnp.int32, (base, 128), 1)
    p = jnp.where(rows // pool == cols, 1.0, 0.0).astype(jnp.bfloat16)

    kernel = functools.partial(_transition_kernel, n_sub=n_sub, pool=pool)

    out = pl.pallas_call(
        kernel,
        out_shape=jax.ShapeDtypeStruct((N, Cout, Lp_pad), out_dtype),
        grid_spec=pltpu.PrefetchScalarGridSpec(
            num_scalar_prefetch=0,
            grid=(N, n_lt),
            in_specs=[
                pl.BlockSpec((1, Cin, tile_l), lambda n, t: (n, 0, t)),
                pl.BlockSpec((Cin, 1), lambda n, t: (0, 0)),
                pl.BlockSpec((Cin, 1), lambda n, t: (0, 0)),
                pl.BlockSpec((Cout, Cin), lambda n, t: (0, 0)),
                pl.BlockSpec((base, 128), lambda n, t: (0, 0)),
            ],
            out_specs=pl.BlockSpec((1, Cout, tile_lp), lambda n, t: (n, 0, t)),
            scratch_shapes=[pltpu.VMEM((Cin, tile_lp), jnp.bfloat16)],
        ),
        compiler_params=pltpu.CompilerParams(
            dimension_semantics=("parallel", "parallel"),
            vmem_limit_bytes=32 << 20),
    )(x_ncl, scale, shift, w, p)

    if Lp_pad != Lp:
        out = out[:, :, :Lp]
    return out


def transition_block_ref(x_ncl, gamma, beta, run_mean, run_var, conv_w, *,
                         pool=2, eps=1e-5):
    """Pure-JAX f32 reference of the same (inference-mode) forward."""
    x = x_ncl.astype(jnp.float32)
    xhat = (x - run_mean[None, :, None]) / jnp.sqrt(run_var[None, :, None] + eps)
    h = jnp.maximum(xhat * gamma[None, :, None] + beta[None, :, None], 0.0)
    y = jnp.einsum("ncl,oc->nol", h, conv_w[:, :, 0].astype(jnp.float32))
    N, Cout, L = y.shape
    Lp = L // pool
    return y[..., :Lp * pool].reshape(N, Cout, Lp, pool).mean(axis=-1)


def _run_case(key, N, Cin, Cout, L, pool, dtype):
    k = jax.random.split(key, 6)
    x = jax.random.normal(k[0], (N, Cin, L), dtype=jnp.float32).astype(dtype)
    gamma = jax.random.normal(k[1], (Cin,), dtype=jnp.float32) * 0.1 + 1.0
    beta = jax.random.normal(k[2], (Cin,), dtype=jnp.float32) * 0.1
    run_mean = jax.random.normal(k[3], (Cin,), dtype=jnp.float32) * 0.1
    run_var = jnp.abs(jax.random.normal(k[4], (Cin,), dtype=jnp.float32)) * 0.1 + 1.0
    conv_w = jax.random.normal(k[5], (Cout, Cin, 1), dtype=jnp.float32) * 0.2

    out = transition_block_pallas(x, gamma, beta, run_mean, run_var, conv_w, pool=pool)
    out = jax.block_until_ready(out)
    ref = transition_block_ref(x, gamma, beta, run_mean, run_var, conv_w, pool=pool)

    assert out.shape == (N, Cout, L // pool), out.shape
    assert out.dtype == x.dtype, out.dtype
    out_f32 = out.astype(jnp.float32)
    # bf16 MXU weights/activations (and bf16 I/O in the bf16 cases) -> relaxed
    # tolerance vs. the f32 reference; this is the documented precision contract.
    assert jnp.allclose(out_f32, ref, atol=5e-2, rtol=5e-2), \
        float(jnp.max(jnp.abs(out_f32 - ref)))


if __name__ == "__main__":
    key = jax.random.PRNGKey(0)
    k1, k2, k3 = jax.random.split(key, 3)

    # f32 I/O, tiny L (exercises the padding path, single pooling sub-block).
    _run_case(k1, N=2, Cin=8, Cout=16, L=16, pool=2, dtype=jnp.float32)
    # bf16 I/O, larger L (exercises the multi-sub-block pooling loop).
    _run_case(k2, N=2, Cin=8, Cout=16, L=1024, pool=2, dtype=jnp.bfloat16)
    # bf16 I/O, pool=3 with L not divisible by pool (floor / tail-drop semantics).
    _run_case(k3, N=2, Cin=8, Cout=4, L=100, pool=3, dtype=jnp.bfloat16)

    print("KERNEL_OK")
</pallas_src>

<mosaic_0001>
module attributes {stable_mosaic.version = 11 : i64} {
  func.func @_transition_kernel(%arg0: i32, %arg1: i32, %arg2: memref<1x8x256xf32, #tpu.memory_space<vmem>>, %arg3: memref<8x1xf32, #tpu.memory_space<vmem>>, %arg4: memref<8x1xf32, #tpu.memory_space<vmem>>, %arg5: memref<16x8xbf16, #tpu.memory_space<vmem>>, %arg6: memref<256x128xbf16, #tpu.memory_space<vmem>>, %arg7: memref<1x16x128xf32, #tpu.memory_space<vmem>>, %arg8: memref<8x128xbf16, #tpu.memory_space<vmem>>) attributes {dimension_semantics = [#tpu.dimension_semantics<parallel>, #tpu.dimension_semantics<parallel>], iteration_bounds = array<i64: 2, 1>, scalar_prefetch = 0 : i64, scratch_operands = 1 : i64, tpu.core_type = #tpu.core_type<tc>, window_params = [{transform_indices = @transform_0, window_bounds = array<i64: 1, 8, 256>}, {pipeline_mode = #tpu.pipeline_mode<synchronous>, transform_indices = @transform_1, window_bounds = array<i64: 8, 1>}, {pipeline_mode = #tpu.pipeline_mode<synchronous>, transform_indices = @transform_2, window_bounds = array<i64: 8, 1>}, {pipeline_mode = #tpu.pipeline_mode<synchronous>, transform_indices = @transform_3, window_bounds = array<i64: 16, 8>}, {pipeline_mode = #tpu.pipeline_mode<synchronous>, transform_indices = @transform_4, window_bounds = array<i64: 256, 128>}, {transform_indices = @transform_5, window_bounds = array<i64: 1, 16, 128>}]} {
    %c0 = arith.constant 0 : index
    %c0_0 = arith.constant 0 : index
    %c0_1 = arith.constant 0 : index
    %0 = vector.load %arg2[%c0, %c0_0, %c0_1] : memref<1x8x256xf32, #tpu.memory_space<vmem>>, vector<1x8x256xf32>
    %1 = vector.shape_cast %0 : vector<1x8x256xf32> to vector<8x256xf32>
    %c0_2 = arith.constant 0 : index
    %c0_3 = arith.constant 0 : index
    %2 = vector.load %arg3[%c0_2, %c0_3] : memref<8x1xf32, #tpu.memory_space<vmem>>, vector<8x1xf32>
    %3 = vector.broadcast %2 : vector<8x1xf32> to vector<8x256xf32>
    %4 = arith.mulf %1, %3 : vector<8x256xf32>
    %c0_4 = arith.constant 0 : index
    %c0_5 = arith.constant 0 : index
    %5 = vector.load %arg4[%c0_4, %c0_5] : memref<8x1xf32, #tpu.memory_space<vmem>>, vector<8x1xf32>
    %6 = vector.broadcast %5 : vector<8x1xf32> to vector<8x256xf32>
    %7 = arith.addf %4, %6 : vector<8x256xf32>
    %cst = arith.constant 0.000000e+00 : f32
    %8 = vector.broadcast %cst : f32 to vector<8x256xf32>
    %9 = arith.maximumf %7, %8 : vector<8x256xf32>
    %10 = arith.truncf %9 : vector<8x256xf32> to vector<8x256xbf16>
    %c0_6 = arith.constant 0 : index
    %c0_7 = arith.constant 0 : index
    %11 = vector.load %arg6[%c0_6, %c0_7] : memref<256x128xbf16, #tpu.memory_space<vmem>>, vector<256x128xbf16>
    %cst_8 = arith.constant dense<0.000000e+00> : vector<8x128xf32>
    %12 = tpu.matmul %10, %11, %cst_8 {dimension_numbers = #tpu.dot_dimension_numbers<[1], [0], [0], [1], [0, 0, 1, 1], [], []>} : vector<8x256xbf16>, vector<256x128xbf16>, vector<8x128xf32> -> vector<8x128xf32>
    %13 = arith.truncf %12 : vector<8x128xf32> to vector<8x128xbf16>
    %c0_9 = arith.constant 0 : index
    %c0_10 = arith.constant 0 : index
    %14 = vector.load %arg8[%c0_9, %c0_10] : memref<8x128xbf16, #tpu.memory_space<vmem>>, vector<8x128xbf16>
    tpu.vector_store %arg8[%c0_9, %c0_10], %13 {strides = array<i32>} : memref<8x128xbf16, #tpu.memory_space<vmem>>, vector<8x128xbf16>,
    %c0_11 = arith.constant 0 : index
    %c0_12 = arith.constant 0 : index
    %15 = vector.load %arg5[%c0_11, %c0_12] : memref<16x8xbf16, #tpu.memory_space<vmem>>, vector<16x8xbf16>
    %c0_13 = arith.constant 0 : index
    %c0_14 = arith.constant 0 : index
    %16 = vector.load %arg8[%c0_13, %c0_14] : memref<8x128xbf16, #tpu.memory_space<vmem>>, vector<8x128xbf16>
    %cst_15 = arith.constant dense<0.000000e+00> : vector<16x128xf32>
    %17 = tpu.matmul %15, %16, %cst_15 {dimension_numbers = #tpu.dot_dimension_numbers<[1], [0], [0], [1], [0, 0, 1, 1], [], []>} : vector<16x8xbf16>, vector<8x128xbf16>, vector<16x128xf32> -> vector<16x128xf32>
    %c0_16 = arith.constant 0 : index
    %c0_17 = arith.constant 0 : index
    %c0_18 = arith.constant 0 : index
    %18 = vector.load %arg7[%c0_16, %c0_17, %c0_18] : memref<1x16x128xf32, #tpu.memory_space<vmem>>, vector<1x16x128xf32>
    %19 = vector.shape_cast %18 : vector<1x16x128xf32> to vector<16x128xf32>
    %20 = vector.shape_cast %17 : vector<16x128xf32> to vector<1x16x128xf32>
    tpu.vector_store %arg7[%c0_16, %c0_17, %c0_18], %20 {strides = array<i32>} : memref<1x16x128xf32, #tpu.memory_space<vmem>>, vector<1x16x128xf32>,
    return
  }
  func.func @transform_0(%arg0: i32, %arg1: i32) -> (i32, i32, i32) {
    %c0_i32 = arith.constant 0 : i32
    %c0_i32_0 = arith.constant 0 : i32
    return %arg0, %c0_i32, %arg1 : i32, i32, i32
  }
  func.func @transform_1(%arg0: i32, %arg1: i32) -> (i32, i32) {
    %c0_i32 = arith.constant 0 : i32
    %c0_i32_0 = arith.constant 0 : i32
    %c0_i32_1 = arith.constant 0 : i32
    return %c0_i32, %c0_i32_0 : i32, i32
  }
  func.func @transform_2(%arg0: i32, %arg1: i32) -> (i32, i32) {
    %c0_i32 = arith.constant 0 : i32
    %c0_i32_0 = arith.constant 0 : i32
    %c0_i32_1 = arith.constant 0 : i32
    return %c0_i32, %c0_i32_0 : i32, i32
  }
  func.func @transform_3(%arg0: i32, %arg1: i32) -> (i32, i32) {
    %c0_i32 = arith.constant 0 : i32
    %c0_i32_0 = arith.constant 0 : i32
    %c0_i32_1 = arith.constant 0 : i32
    return %c0_i32, %c0_i32_0 : i32, i32
  }
  func.func @transform_4(%arg0: i32, %arg1: i32) -> (i32, i32) {
    %c0_i32 = arith.constant 0 : i32
    %c0_i32_0 = arith.constant 0 : i32
    %c0_i32_1 = arith.constant 0 : i32
    return %c0_i32, %c0_i32_0 : i32, i32
  }
  func.func @transform_5(%arg0: i32, %arg1: i32) -> (i32, i32, i32) {
    %c0_i32 = arith.constant 0 : i32
    %c0_i32_0 = arith.constant 0 : i32
    return %arg0, %c0_i32, %arg1 : i32, i32, i32
  }
}

</mosaic_0001>

<bundles_post_ra>
// kernel: tpu_custom_call.1
= control target key start
LH: loop header
LB: loop body
LE: loop exit
PB: predicated region body
PF: predicated region fallthrough
CT: control target
= control target key end

     0   :  { %10 = vsyncpa [#allocation4], 0  ;;  %s1131_s0 = inlined_call_operand.hbm [shape: f32[2,8,256], index: 0, kind: input, shape index: {}]   ;;  %s1132_s1 = inlined_call_operand.vmem [shape: f32[8,1], index: 1, kind: input, shape index: {}]   ;;  %s1133_s2 = inlined_call_operand.vmem [shape: f32[8,1], index: 2, kind: input, shape index: {}]   ;;  %s1134_s3 = inlined_call_operand.vmem [shape: bf16[16,8], index: 3, kind: input, shape index: {}]   ;;  %s1135_s4 = inlined_call_operand.hbm [shape: bf16[256,128], index: 4, kind: input, shape index: {}]   ;;  %s1136_s5 = inlined_call_operand.hbm [shape: f32[2,16,128], index: 5, kind: output, shape index: {}]  }
   0x1   :  { %12 = vsyncpa [#allocation4 + $0x1], 0 }
   0x2   :  { %13 = vsyncpa [#allocation7], 0 }
   0x3   :  { %14 = vsyncpa [#allocation5], 0 }
   0x4   :  { %16 = vsyncpa [#allocation5 + $0x1], 0  ;;  %s971_s18 = smov 0   ;;  %s973_s19 = smov 0  }
   0x5   :  { %s975_s20 = smov 0   ;;  %s977_s21 = smov 0  }
   0x6   :  { %s979_s22 = smov 0   ;;  %s981_s23 = smov 0  }
   0x7 LB: > { %s603_s24 = sadd.s32 4294967295, %s933_s23   ;;  %p605_p0 = scmp.ge.s32.totalorder %s933_s23, 1  ;;  %s933_s23 = sphi %s981_s23, %s22_s23   ;;  %s929_s22 = sphi %s979_s22, %s1147_s22   ;;  %s925_s21 = sphi %s977_s21, %s1146_s21   ;;  %s921_s20 = sphi %s975_s20, %s1145_s20   ;;  %s917_s19 = sphi %s973_s19, %s1144_s19   ;;  %s913_s18 = sphi %s971_s18, %s1143_s18  }
   0x8   : > { %p1003_p1 = scmp.eq.s32.totalorder %s603_s24, 0  ;;  %p179_p2 = scmp.lt.s32.totalorder %s933_s23, 3 }
   0x9   : > { %s199_s28 = sshll.u32 %s1135_s4, 4  ;;  %s935_s30 = smov [#allocation6]   ;;  %s200_s28 = int_to_ptr.hbm [resolvable:$true] %s199_s28 }
   0xa   : > { %p1011_p3 = pnand %p605_p0, %p179_p2  ;;  %s201_s6 = sshll.u32 %s935_s30, 4  ;;  %s202_s6 = int_to_ptr.vmem [resolvable:$true] %s201_s6 }
   0xb   : > { %p607_p6 = scmp.ge.s32.totalorder %s933_s23, 2  ;;  %s936_s7 = smov 64  }
   0xc   : > { %p716_p4 = pneg %p1011_p3  ;;  %s937_s8 = smov 4  }
   0xd   : > { %s604_s9 = sadd.s32 4294967294, %s933_s23   ;;  %s34_s10 = sadd.s32 1, %s929_s22 }
   0xe   : > { %p717_p5 = pnand %p716_p4, %p1003_p1  ;;  %s43_s11 = sadd.s32 1, %s921_s20 }
   0xf   : > { %p36_p7 = scmp.ge.s32.totalorder %s34_s10, 2  ;;  %p50_p8 = scmp.ne.s32.totalorder %s921_s20, %s917_s19 }
  0x10   : > { %719 = dma.hbm_to_vmem [thread:$0]  (!%p717_p5), %s200_s28, 2048, %s202_s6, [#allocation7], %s936_s7, %s936_s7, %s937_s8  }
  0x11   : > { %p51_p9 = scmp.eq.s32.totalorder %s933_s23, 0  ;;  %p56_p10 = scmp.ne.s32.totalorder %s917_s19, %s913_s18 }
  0x12   : > { %s1149_s10 = smov (%p36_p7, %s34_s10), 0  ;;  %p166_p13 = scmp.eq.s32.totalorder %s603_s24, 1 }
  0x13   : > { %p1030_p11 = por %p51_p9, %p50_p8  ;;  %p1036_p12 = por %p1003_p1, %p56_p10 }
  0x14   : > { %s38_s14 = ssub.s32 %s929_s22, %s1149_s10  ;;  %p172_p2 = scmp.eq.s32.totalorder %s604_s9, 1 }
  0x15   : > { %p41_p0 = scmp.eq.s32.totalorder %s38_s14, 0  ;;  %p1042_p4 = por %p166_p13, %p50_p8 }
  0x16   : > { %p729_p5 = scmp.lt.s32.totalorder %s933_s23, 2  ;;  %p1050_p7 = por %p172_p2, %p56_p10 }
  0x17   : > { %s1048_s16 = scalar_select %p41_p0, %s921_s20, %s43_s11  }
  0x18   : > { %s215_s26 = sand.u32 1, %s921_s20   ;;  %s689_s28 = sshll.u32 %s929_s22, 4 }
  0x19   : > { %s608_s27 = sshll.u32 %s215_s26, 4  ;;  %s226_s24 = scalar_lea.hbm %s1131_s0, %s689_s28 }
  0x1a   : > { %s219_s7 = scalar_lea.vmem [#allocation3], %s608_s27  ;;  %s228_s9 = sshll.u32 %s226_s24, 4  ;;  %s229_s9 = int_to_ptr.hbm [resolvable:$true] %s228_s9 }
  0x1b   : > { %s230_s8 = sshll.u32 %s219_s7, 4  ;;  %p721_p8 = pnand %p729_p5, %p1030_p11  ;;  %s231_s8 = int_to_ptr.vmem [resolvable:$true] %s230_s8 }
  0x1c   : > { %s216_s11 = scalar_lea.sflag [#allocation4], %s215_s26  ;;  %239 = sbr.rel (%p1011_p3) target bundleno = 453 (0x1c5), region = 40 }
  0x1d   : > { %723 = dma.hbm_to_vmem [thread:$0]  (!%p721_p8), %s229_s9, 256, %s231_s8, %s216_s11  }
  0x1e   : > { %s1064_s14 = sand.u32 (!%p1011_p3), 1, %s917_s19  }
  0x1f   : > { %s612_s28 = sshll.u32 (!%p1011_p3), %s1064_s14, 4  ;;  %s242_s27 = scalar_lea.sflag (!%p1011_p3), [#allocation4], %s1064_s14 }
  0x20   : > { %s1070_s30 = scalar_lea.vmem (!%p1011_p3), [#allocation3], %s612_s28 }
  0x21   : > { %900 = dma.done.wait (%p1036_p12), %s242_s27, 256  }
  0x22   : > { %902 = vsyncadd (%p1036_p12), %s242_s27, 4294967040 }
  0x23   : > { %904 = dma.done.wait (%p1003_p1), [#allocation7], 2048  }
  0x24   : > { %906 = vsyncadd (%p1003_p1), [#allocation7], 4294965248  ;;  %v938_v0 = vmov 0   ;;  %v282_v1 = vld [vmem:[%s1132_s1] sm:$0xff]  ;;  %v696_v4 = vld [vmem:[#allocation6 + $0x30] sm:$0xff]  ;;  %vm470_vm0 = vcmask 1043456  }
  0x25   : > { %786 = vset.pattern.permute.xlu0 %v938_v0  ;;  %v697_v2 = vld [vmem:[#allocation6 + $0x38] sm:$0xff]  ;;  %v704_v5 = vld [vmem:[#allocation6 + $0x70] sm:$0xff]  ;;  %v695_v7 = vld [vmem:[#allocation6 + $0x28] sm:$0xff]  ;;  %vm466_vm1 = vcmask 64512   ;;  %s707_s24 = sshll.u32 %s925_s21, 4  ;;  %s277_s11 = scalar_lea.vmem [#allocation8], %s612_s28 }
  0x26   : > { %285 = vperm.xlu0 %786, %v282_v1   ;;  %v705_v3 = vld [vmem:[#allocation6 + $0x78] sm:$0xff]  ;;  %430 = vmatpush.bf16.msra.mxu0 %v697_v2  ;;  %v703_v8 = vld [vmem:[#allocation6 + $0x68] sm:$0xff]  ;;  %v694_v9 = vld [vmem:[#allocation6 + $0x20] sm:$0xff]  ;;  %s503_s9 = scalar_lea.hbm %s1136_s5, %s707_s24  ;;  %s504_s27 = sshll.u32 %s277_s11, 4  ;;  %s505_s27 = int_to_ptr.vmem [resolvable:$true] %s504_s27 }
  0x27   : > { %443 = vmatpush.bf16.msra.mxu1 %v705_v3  ;;  %v290_v6 = vld [vmem:[%s1133_s2] sm:$0xff]  ;;  %v692_v13 = vld [vmem:[#allocation6 + $0x10] sm:$0xff]  ;;  %v691_v15 = vld [vmem:[#allocation6 + $0x8] sm:$0xff]  ;;  %s491_s29 = scalar_lea.sflag [#allocation5], %s1064_s14  ;;  %s867_s25 = scalar_lea.hbm %s1136_s5, 32 }
  0x28   : > { %v702_v10 = vld [vmem:[#allocation6 + $0x60] sm:$0xff]  ;;  %v693_v11 = vld [vmem:[#allocation6 + $0x18] sm:$0xff]  ;;  %v700_v14 = vld [vmem:[#allocation6 + $0x50] sm:$0xff] }
  0x29   : > { %v701_v12 = vld [vmem:[#allocation6 + $0x58] sm:$0xff]  ;;  %v699_v16 = vld [vmem:[#allocation6 + $0x48] sm:$0xff]  ;;  %v690_v17 = vld [vmem:[#allocation6] sm:$0xff] }
  0x2a   : > { %431 = vmatpush.bf16.msra.mxu0 %v696_v4  ;;  %v698_v18 = vld [vmem:[#allocation6 + $0x40] sm:$0xff]  ;;  %v281_v21 = vld [vmem:[%s1070_s30 + $0x8] sm:$0xff] }
  0x2b   : > { %444 = vmatpush.bf16.msra.mxu1 %v704_v5  ;;  %v280_v20 = vld [vmem:[%s1070_s30] sm:$0xff]  ;;  %s506_s30 = sshll.u32 %s503_s9, 4  ;;  %s507_s30 = int_to_ptr.hbm [resolvable:$true] %s506_s30 }
  0x2c   : > { %v706_v39 = vld [vmem:[%s1134_s3] sm:$0xff]  ;;  %s861_s12 = sshra.s32 %s507_s30, 4  ;;  %s862_s12 = int_to_ptr.hbm [resolvable:$true] %s861_s12 }
  0x2d   : > { %s863_s13 = scalar_lea.hbm %s862_s12, 16  ;;  %p868_p10 = scmp.lt.s32.totalorder %s862_s12, %s1136_s5 }
  0x2e   : > { %293 = vperm.xlu0 %786, %v290_v6   ;;  %432 = vmatpush.bf16.msra.mxu0 %v695_v7  ;;  %p864_p1 = scmp.ne.s32.totalorder %s862_s12, %s863_s13  ;;  %p869_p11 = scmp.lt.s32.totalorder %s867_s25, %s863_s13 }
  0x2f   : > { %445 = vmatpush.bf16.msra.mxu1 %v703_v8 }
  0x30   : > { %p865_p3 = pnand %p864_p1, %p1042_p4  ;;  %p870_p12 = por %p869_p11, %p868_p10 }
  0x32   : > { %433 = vmatpush.bf16.msra.mxu0 %v694_v9  ;;  %p866_p9 = pneg %p865_p3 }
  0x33   : > { %446 = vmatpush.bf16.msra.mxu1 %v702_v10 }
  0x34   : > { %p871_p13 = pnand %p870_p12, %p866_p9 }
  0x36   : > { %434 = vmatpush.bf16.msra.mxu0 %v693_v11 }
  0x37   : > { %447 = vmatpush.bf16.msra.mxu1 %v701_v12 }
  0x3a   : > { %435 = vmatpush.bf16.msra.mxu0 %v692_v13 }
  0x3b   : > { %448 = vmatpush.bf16.msra.mxu1 %v700_v14 }
  0x3e   : > { %436 = vmatpush.bf16.msra.mxu0 %v691_v15 }
  0x3f   : > { %449 = vmatpush.bf16.msra.mxu1 %v699_v16 }
  0x42   : > { %437 = vmatpush.bf16.msra.mxu0 %v690_v17 }
  0x43   : > { %450 = vmatpush.bf16.msra.mxu1 %v698_v18 }
  0x98   : > { %v286_v19 = vpop.permute.xlu0 %285 }
  0x99   : > { %v288_v22 = vmul.f32 %v286_v19, %v280_v20  ;;  %v289_v23 = vmul.f32 %v286_v19, %v281_v21 }
  0xa0   : > { %v294_v24 = vpop.permute.xlu0 %293 }
  0xa1   : > { %v296_v25 = vadd.f32 %v294_v24, %v288_v22  ;;  %v297_v26 = vadd.f32 %v294_v24, %v289_v23 }
  0xa3   : > { %v298_v27 = vmax.f32 %v296_v25, 0.0  ;;  %v299_v28 = vmax.f32 %v297_v26, 0.0 }
  0xa5   : > { %v300_v29 = vpack.c.bf16 %v298_v27, %v298_v27  ;;  %v301_v30 = vpack.c.bf16 %v299_v28, %v299_v28 }
  0xa7   : > { %438 = vmatmul.bf16.vlgmr.msra.gmra.mxu0 %v300_v29  ;;  %451 = vmatmul.bf16.vlgmr.msra.gmra.mxu1 %v301_v30 }
 0x124   : > { %v439_v31 = vpop.f32.mrf.mxu0  ;;  %v452_v32 = vpop.f32.mrf.mxu1 }
 0x125   : > { %v453_v33 = vadd.f32 %v452_v32, %v439_v31 }
 0x127   : > { %v456_v34 = vpack.c.bf16 %v453_v33, %v453_v33 }
 0x129   : > { %457 = vst [vmem:[#allocation2] sm:$0xf] %v456_v34 }
 0x12c   : > { %v441_v35 = vpop.f32.mrf.mxu0  ;;  %v454_v36 = vpop.f32.mrf.mxu1 }
 0x130   : > { %v460_v37 = vld [vmem:[#allocation2] sm:$0xf] }
 0x131   : > { %v472_v38 = vsel %vm470_vm0, %v460_v37, 0 }
 0x132   : > { %481 = vmatpush.bf16.msra.mxu2 %v472_v38 }
 0x135   : > { %683 = vmatmul.msk.bf16.vlgmr.msra.gmra.mxu2 %vm466_vm1, %v706_v39 }
 0x1b8   : > { %v483_v40 = vpop.f32.mrf.mxu2 }
 0x1b9   : > { %488 = vst [vmem:[%s277_s11] sm:$0xff] %v483_v40 }
 0x1c0   : > { %v485_v41 = vpop.f32.mrf.mxu2 }
 0x1c1   : > { %489 = vst [vmem:[%s277_s11 + $0x8] sm:$0xff] %v485_v41 }
 0x1c2   : > { %874 = shalt.err (!%p871_p13)
}
 0x1c3   : > { %s939_s14 = smov 128   ;;  %s940_s24 = smov 8  }
 0x1c4   : > { %714 = dma.vmem_to_hbm [thread:$0]  (%p1042_p4), %s505_s27, 256, %s507_s30, %s491_s29, %s939_s14, %s939_s14, %s940_s24  }
 0x1c5 PF: > { %s521_s7 = sand.u32 1, %s913_s18   ;;  %p725_p0 = pnand %p607_p6, %p1050_p7 }
 0x1c6   : > { %s522_s8 = scalar_lea.sflag [#allocation5], %s521_s7 }
 0x1c7   : > { %p726_p2 = pneg %p725_p0 }
 0x1c9   : > { %908 = dma.done.wait (%p726_p2), %s522_s8, 256  }
 0x1ca   : > { %910 = vsyncadd (%p726_p2), %s522_s8, 4294967040  ;;  %s22_s23 = sadd.s32 1, %s933_s23   ;;  %s1143_s18 = smov %s917_s19 }
 0x1cb   : > { %p19_p5 = scmp.ge.s32.totalorder %s22_s23, 4   ;;  %s1144_s19 = smov %s921_s20 }
 0x1cc   : > { %s1145_s20 = smov %s1048_s16  ;;  %s1146_s21 = smov %s929_s22 }
 0x1cd   : > { %s1147_s22 = smov %s1149_s10  ;;  %21 = sbr.rel (!%p19_p5) target bundleno = 7 (0x7), region = 89 }
 0x1d2   :  { %528 = vsyncpa [#allocation4], 1 }
 0x1d3   :  { %530 = vsyncpa [#allocation4 + $0x1], 1 }
 0x1d4   :  { %531 = vsyncpa [#allocation7], 1 }
 0x1d5   :  { %532 = vsyncpa [#allocation5], 1 }
 0x1d6   :  { %534 = vsyncpa [#allocation5 + $0x1], 1 }

</bundles_post_ra>
